<compile_context>
chip_gen: v7x
topology: tpu7x:2x2x1
jax: 0.10.0
libtpu: 0.0.40
codegen_flags: <defaults>
</compile_context>

<pallas_src>
import functools
import math

import jax
import jax.numpy as jnp
from jax import lax
from jax.experimental import pallas as pl
from jax.experimental.pallas import tpu as pltpu

D_MODEL = 32
NHEAD = 4
DIM_FF = 64
LN_EPS = 1e-5


def _encoder_layer_kernel(x_ref, wqkv_ref, wo_ref, w1_ref, w2_ref, vec_ref,
                          o_ref, *, seq_len, nhead, matmul_dtype):
    """One grid step processes `batch_block` batch elements, flattened to rows.

    x_ref / o_ref : [batch_block * seq_len, d_model]
    wqkv_ref      : [d_model, 3*d_model]   fused Q|K|V weights (Q pre-scaled)
    wo_ref        : [d_model, d_model]     out-proj weight
    w1_ref        : [d_model, dim_ff]
    w2_ref        : [dim_ff, d_model]
    vec_ref       : [8, max(3*d_model, dim_ff)] fused bias / LayerNorm slab
                    rows: 0 qkv_bias | 1 out_bias | 2 ffn_b1 | 3 ffn_b2
                          4 ln1_g | 5 ln1_b | 6 ln2_g | 7 ln2_b
    """
    n_rows, d = x_ref.shape
    hd = d // nhead
    bt = n_rows // seq_len
    f_dim = w1_ref.shape[1]

    def mm(a, b):  # MXU matmul with f32 accumulation
        return jnp.dot(a.astype(matmul_dtype), b.astype(matmul_dtype),
                       preferred_element_type=jnp.float32)

    # ---- fused QKV projection: one wide matmul (96 output lanes), bias fused.
    qkv = mm(x_ref[...].astype(jnp.float32), wqkv_ref[...]) + vec_ref[0:1, 0:3 * d]

    # ---- split per head (static lane slices) and fold heads into the batch dim.
    def to_batched(base):  # -> [H*bt, seq_len, hd], batch index = h*bt + b
        parts = [qkv[:, base + h * hd: base + (h + 1) * hd] for h in range(nhead)]
        return jnp.stack(parts, axis=0).reshape(nhead * bt, seq_len, hd)

    qb = to_batched(0).astype(matmul_dtype)
    kb = to_batched(d).astype(matmul_dtype)
    vb = to_batched(2 * d).astype(matmul_dtype)

    # ---- scores / softmax / PV, batched over all heads and batch elements.
    # (1/sqrt(hd) scale already folded into Wq / bq at pack time.)
    s = jnp.einsum("bqd,bkd->bqk", qb, kb, preferred_element_type=jnp.float32)
    s = s - jnp.max(s, axis=-1, keepdims=True)
    p = jnp.exp(s)
    den = jnp.sum(p, axis=-1, keepdims=True)
    r = pl.reciprocal(den, approx=True)       # EUP slot (off the VPU)
    r = r * (2.0 - den * r)                   # one Newton step -> near-exact softmax
    p = p * r
    ctx = jnp.einsum("bqk,bkd->bqd", p.astype(matmul_dtype), vb,
                     preferred_element_type=jnp.float32)       # [H*bt, S, hd]

    # ---- repack heads into the lane dim and do a single output projection.
    ctx2d = jnp.concatenate(
        [ctx[h * bt:(h + 1) * bt].reshape(n_rows, hd) for h in range(nhead)],
        axis=-1)                                               # [N, D]
    attn = mm(ctx2d, wo_ref[...]) + vec_ref[1:2, 0:d]
    # TODO(synk): dropout (p=0.1) is identity here (inference/eval semantics).

    # ---- residual + LayerNorm 1 (post-norm); re-read x_ref (short live range).
    h1 = x_ref[...].astype(jnp.float32) + attn
    mu1 = jnp.mean(h1, axis=-1, keepdims=True)
    var1 = jnp.mean((h1 - mu1) ** 2, axis=-1, keepdims=True)
    h1n = (h1 - mu1) * lax.rsqrt(var1 + LN_EPS) * vec_ref[4:5, 0:d] + vec_ref[5:6, 0:d]

    # ---- feed forward: linear -> relu -> linear
    ff = jnp.maximum(mm(h1n, w1_ref[...]) + vec_ref[2:3, 0:f_dim], 0.0)
    ff = mm(ff, w2_ref[...]) + vec_ref[3:4, 0:d]

    # ---- residual + LayerNorm 2
    h2 = h1n + ff
    mu2 = jnp.mean(h2, axis=-1, keepdims=True)
    var2 = jnp.mean((h2 - mu2) ** 2, axis=-1, keepdims=True)
    out = (h2 - mu2) * lax.rsqrt(var2 + LN_EPS) * vec_ref[6:7, 0:d] + vec_ref[7:8, 0:d]

    o_ref[...] = out.astype(o_ref.dtype)      # single slab store per step


def _pick_batch_block(B, S):
    """Pick rows-per-step ~512-2048 with >=4 grid steps when possible, so
    BlockSpec double-buffering overlaps DMA with compute and the 'parallel'
    grid axis can be sharded across v7x's two TensorCores."""
    divisors = [d for d in range(1, B + 1) if B % d == 0]

    def ok_rows(d):  # second-minor block dim must be a multiple of 8 (or full)
        return (d * S) % 8 == 0 or d == B

    best = None
    for d in divisors:
        if ok_rows(d) and 512 <= d * S <= 2048 and B // d >= 4:
            best = d if best is None else max(best, d)
    if best is None:
        for d in divisors:
            if ok_rows(d) and d * S <= 2048 and B // d >= 4:
                best = d if best is None else max(best, d)
    if best is None:
        cands = [d for d in divisors if ok_rows(d) and d * S <= 2048]
        best = max(cands) if cands else B
    return best


@functools.partial(jax.jit, static_argnames=("batch_block", "matmul_dtype"))
def transformer_self_attention_block(src, params, batch_block=None,
                                     matmul_dtype=jnp.float32):
    """src: [B, S, D] (batch_first).  Returns [B, S, D].
    # TODO(synk): attention masks (src_mask / src_key_padding_mask / is_causal)
    # not implemented.
    """
    wqkv, wo, w1, w2, vec = params
    B, S, D = src.shape
    if batch_block is None:
        batch_block = _pick_batch_block(B, S)
    assert B % batch_block == 0, "B must be divisible by batch_block"
    rows = batch_block * S

    x2d = src.reshape(B * S, D)            # free host-side flatten: batch -> rows
    params_list = [wqkv, wo, w1, w2, vec]  # all 2-D slabs, full-block specs
    param_specs = [pl.BlockSpec(p.shape, lambda i: (0, 0)) for p in params_list]

    kernel = functools.partial(_encoder_layer_kernel, seq_len=S, nhead=NHEAD,
                               matmul_dtype=matmul_dtype)
    out2d = pl.pallas_call(
        kernel,
        out_shape=jax.ShapeDtypeStruct((B * S, D), src.dtype),
        grid_spec=pltpu.PrefetchScalarGridSpec(
            num_scalar_prefetch=0,
            grid=(B // batch_block,),
            in_specs=[pl.BlockSpec((rows, D), lambda i: (i, 0))] + param_specs,
            out_specs=pl.BlockSpec((rows, D), lambda i: (i, 0)),
        ),
        compiler_params=pltpu.CompilerParams(
            dimension_semantics=("parallel",),
            # Blocks are <= 2048x32 f32 (~256 KiB) + small temporaries, well
            # under the default scoped VMEM on v5e/v6e/v7x; no explicit limit.
        ),
    )(x2d, *params_list)
    return out2d.reshape(B, S, D)


def pack_params(in_proj_w, in_proj_b, out_proj_w, out_proj_b,
                lin1_w, lin1_b, lin2_w, lin2_b,
                ln1_g, ln1_b, ln2_g, ln2_b,
                d_model=D_MODEL, nhead=NHEAD, dim_ff=DIM_FF,
                param_dtype=jnp.float32):
    """Host-side one-time repack of torch-layout TransformerEncoderLayer weights:
    fused QKV slab (softmax scale folded into Q), (in,out) layouts, fused
    bias/LayerNorm vector slab. Set param_dtype=jnp.bfloat16 on v6e/v7x to halve
    weight DMA and remove per-step casts (f32 accumulation is kept in-kernel)."""
    D, F = d_model, dim_ff
    hd = D // nhead
    scale = 1.0 / math.sqrt(hd)

    def io(w):  # torch Linear weight [out, in] -> [in, out]
        return jnp.asarray(w, jnp.float32).T

    wq = io(in_proj_w[0 * D:1 * D]) * scale     # fold softmax scale (host, once)
    wk = io(in_proj_w[1 * D:2 * D])
    wv = io(in_proj_w[2 * D:3 * D])
    wqkv = jnp.concatenate([wq, wk, wv], axis=1).astype(param_dtype)   # [D, 3D]

    bq = jnp.asarray(in_proj_b[0 * D:1 * D], jnp.float32) * scale
    bk = jnp.asarray(in_proj_b[1 * D:2 * D], jnp.float32)
    bv = jnp.asarray(in_proj_b[2 * D:3 * D], jnp.float32)

    wo = io(out_proj_w).astype(param_dtype)     # [D, D]
    w1 = io(lin1_w).astype(param_dtype)         # [D, F]
    w2 = io(lin2_w).astype(param_dtype)         # [F, D]

    width = max(3 * D, F)
    vec = jnp.zeros((8, width), jnp.float32)
    vec = vec.at[0, :3 * D].set(jnp.concatenate([bq, bk, bv]))
    vec = vec.at[1, :D].set(jnp.asarray(out_proj_b, jnp.float32))
    vec = vec.at[2, :F].set(jnp.asarray(lin1_b, jnp.float32))
    vec = vec.at[3, :D].set(jnp.asarray(lin2_b, jnp.float32))
    vec = vec.at[4, :D].set(jnp.asarray(ln1_g, jnp.float32))
    vec = vec.at[5, :D].set(jnp.asarray(ln1_b, jnp.float32))
    vec = vec.at[6, :D].set(jnp.asarray(ln2_g, jnp.float32))
    vec = vec.at[7, :D].set(jnp.asarray(ln2_b, jnp.float32))
    return (wqkv, wo, w1, w2, vec)


def init_params(key, d_model=D_MODEL, nhead=NHEAD, dim_ff=DIM_FF):
    """Deterministic synthetic parameters with nn.TransformerEncoderLayer shapes
    (torch layout), repacked into the kernel layout."""
    ks = jax.random.split(key, 8)
    s = 0.05
    in_proj_w = jax.random.normal(ks[0], (3 * d_model, d_model), jnp.float32) * s
    in_proj_b = jax.random.normal(ks[1], (3 * d_model,), jnp.float32) * s
    out_proj_w = jax.random.normal(ks[2], (d_model, d_model), jnp.float32) * s
    out_proj_b = jax.random.normal(ks[3], (d_model,), jnp.float32) * s
    lin1_w = jax.random.normal(ks[4], (dim_ff, d_model), jnp.float32) * s
    lin1_b = jax.random.normal(ks[5], (dim_ff,), jnp.float32) * s
    lin2_w = jax.random.normal(ks[6], (d_model, dim_ff), jnp.float32) * s
    lin2_b = jax.random.normal(ks[7], (d_model,), jnp.float32) * s
    ln1_g = jnp.ones((d_model,), jnp.float32)
    ln1_b = jnp.zeros((d_model,), jnp.float32)
    ln2_g = jnp.ones((d_model,), jnp.float32)
    ln2_b = jnp.zeros((d_model,), jnp.float32)
    return pack_params(in_proj_w, in_proj_b, out_proj_w, out_proj_b,
                       lin1_w, lin1_b, lin2_w, lin2_b,
                       ln1_g, ln1_b, ln2_g, ln2_b,
                       d_model=d_model, nhead=nhead, dim_ff=dim_ff)


def _reference(src, params):
    """Pure-JAX reference (standard batched MHA formulation) for correctness."""
    wqkv, wo, w1, w2, vec = params
    D = wo.shape[0]
    F = w1.shape[1]
    H = NHEAD
    hd = D // H
    B, S, _ = src.shape
    x = src.astype(jnp.float32)

    qkv = x @ wqkv.astype(jnp.float32) + vec[0, :3 * D]
    q, k, v = qkv[..., :D], qkv[..., D:2 * D], qkv[..., 2 * D:]

    def split(t):
        return t.reshape(B, S, H, hd).transpose(0, 2, 1, 3)

    q, k, v = split(q), split(k), split(v)
    s = jnp.einsum("bhqd,bhkd->bhqk", q, k)   # scale already folded into Wq/bq
    p = jax.nn.softmax(s, axis=-1)
    ctx = jnp.einsum("bhqk,bhkd->bhqd", p, v).transpose(0, 2, 1, 3).reshape(B, S, D)
    attn = ctx @ wo.astype(jnp.float32) + vec[1, :D]

    def ln(t, g, b):
        mu = jnp.mean(t, axis=-1, keepdims=True)
        var = jnp.mean((t - mu) ** 2, axis=-1, keepdims=True)
        return (t - mu) * lax.rsqrt(var + LN_EPS) * g + b

    h1 = ln(x + attn, vec[4, :D], vec[5, :D])
    ff = jnp.maximum(h1 @ w1.astype(jnp.float32) + vec[2, :F], 0.0)
    ff = ff @ w2.astype(jnp.float32) + vec[3, :D]
    return ln(h1 + ff, vec[6, :D], vec[7, :D])


if __name__ == "__main__":
    B, S = 2, 8
    key = jax.random.PRNGKey(0)
    k_x, k_p = jax.random.split(key)
    x = jax.random.normal(k_x, (B, S, D_MODEL), jnp.float32)
    params = init_params(k_p)

    out = transformer_self_attention_block(x, params)
    out = jax.block_until_ready(out)

    ref = _reference(x, params)
    assert out.shape == (B, S, D_MODEL)
    # Newton-refined EUP reciprocal makes the softmax near-exact, so a tight
    # tolerance holds against the exact-division reference.
    assert jnp.allclose(out, ref, atol=5e-4, rtol=5e-4), "mismatch vs pure-JAX reference"
    print("KERNEL_OK")
</pallas_src>

<mosaic_0001>
module attributes {stable_mosaic.version = 11 : i64} {
  func.func @_encoder_layer_kernel(%arg0: i32, %arg1: memref<16x32xf32, #tpu.memory_space<vmem>>, %arg2: memref<32x96xf32, #tpu.memory_space<vmem>>, %arg3: memref<32x32xf32, #tpu.memory_space<vmem>>, %arg4: memref<32x64xf32, #tpu.memory_space<vmem>>, %arg5: memref<64x32xf32, #tpu.memory_space<vmem>>, %arg6: memref<8x96xf32, #tpu.memory_space<vmem>>, %arg7: memref<16x32xf32, #tpu.memory_space<vmem>>) attributes {dimension_semantics = [#tpu.dimension_semantics<parallel>], iteration_bounds = array<i64: 1>, scalar_prefetch = 0 : i64, scratch_operands = 0 : i64, tpu.core_type = #tpu.core_type<tc>, window_params = [{transform_indices = @transform_0, window_bounds = array<i64: 16, 32>}, {pipeline_mode = #tpu.pipeline_mode<synchronous>, transform_indices = @transform_1, window_bounds = array<i64: 32, 96>}, {pipeline_mode = #tpu.pipeline_mode<synchronous>, transform_indices = @transform_2, window_bounds = array<i64: 32, 32>}, {pipeline_mode = #tpu.pipeline_mode<synchronous>, transform_indices = @transform_3, window_bounds = array<i64: 32, 64>}, {pipeline_mode = #tpu.pipeline_mode<synchronous>, transform_indices = @transform_4, window_bounds = array<i64: 64, 32>}, {pipeline_mode = #tpu.pipeline_mode<synchronous>, transform_indices = @transform_5, window_bounds = array<i64: 8, 96>}, {transform_indices = @transform_6, window_bounds = array<i64: 16, 32>}]} {
    %c0 = arith.constant 0 : index
    %c0_0 = arith.constant 0 : index
    %0 = vector.load %arg1[%c0, %c0_0] : memref<16x32xf32, #tpu.memory_space<vmem>>, vector<16x32xf32>
    %c0_1 = arith.constant 0 : index
    %c0_2 = arith.constant 0 : index
    %1 = vector.load %arg2[%c0_1, %c0_2] : memref<32x96xf32, #tpu.memory_space<vmem>>, vector<32x96xf32>
    %cst = arith.constant dense<0.000000e+00> : vector<16x96xf32>
    %2 = tpu.matmul %0, %1, %cst {dimension_numbers = #tpu.dot_dimension_numbers<[1], [0], [0], [1], [0, 0, 1, 1], [], []>} : vector<16x32xf32>, vector<32x96xf32>, vector<16x96xf32> -> vector<16x96xf32>
    %c0_3 = arith.constant 0 : index
    %c0_4 = arith.constant 0 : index
    %3 = vector.load %arg6[%c0_3, %c0_4] : memref<8x96xf32, #tpu.memory_space<vmem>>, vector<1x96xf32>
    %4 = vector.broadcast %3 : vector<1x96xf32> to vector<16x96xf32>
    %5 = arith.addf %2, %4 : vector<16x96xf32>
    %6 = vector.extract_strided_slice %5 {offsets = [0, 0], sizes = [16, 8], strides = [1, 1]} : vector<16x96xf32> to vector<16x8xf32>
    %7 = vector.extract_strided_slice %5 {offsets = [0, 8], sizes = [16, 8], strides = [1, 1]} : vector<16x96xf32> to vector<16x8xf32>
    %8 = vector.extract_strided_slice %5 {offsets = [0, 16], sizes = [16, 8], strides = [1, 1]} : vector<16x96xf32> to vector<16x8xf32>
    %9 = vector.extract_strided_slice %5 {offsets = [0, 24], sizes = [16, 8], strides = [1, 1]} : vector<16x96xf32> to vector<16x8xf32>
    %10 = vector.shape_cast %6 : vector<16x8xf32> to vector<1x16x8xf32>
    %11 = vector.shape_cast %7 : vector<16x8xf32> to vector<1x16x8xf32>
    %12 = vector.shape_cast %8 : vector<16x8xf32> to vector<1x16x8xf32>
    %13 = vector.shape_cast %9 : vector<16x8xf32> to vector<1x16x8xf32>
    %14 = tpu.concatenate %10, %11, %12, %13 in 0 : vector<1x16x8xf32>, vector<1x16x8xf32>, vector<1x16x8xf32>, vector<1x16x8xf32> -> vector<4x16x8xf32>
    %15 = vector.shape_cast %14 : vector<4x16x8xf32> to vector<8x8x8xf32>
    %16 = vector.extract_strided_slice %5 {offsets = [0, 32], sizes = [16, 8], strides = [1, 1]} : vector<16x96xf32> to vector<16x8xf32>
    %17 = vector.extract_strided_slice %5 {offsets = [0, 40], sizes = [16, 8], strides = [1, 1]} : vector<16x96xf32> to vector<16x8xf32>
    %18 = vector.extract_strided_slice %5 {offsets = [0, 48], sizes = [16, 8], strides = [1, 1]} : vector<16x96xf32> to vector<16x8xf32>
    %19 = vector.extract_strided_slice %5 {offsets = [0, 56], sizes = [16, 8], strides = [1, 1]} : vector<16x96xf32> to vector<16x8xf32>
    %20 = vector.shape_cast %16 : vector<16x8xf32> to vector<1x16x8xf32>
    %21 = vector.shape_cast %17 : vector<16x8xf32> to vector<1x16x8xf32>
    %22 = vector.shape_cast %18 : vector<16x8xf32> to vector<1x16x8xf32>
    %23 = vector.shape_cast %19 : vector<16x8xf32> to vector<1x16x8xf32>
    %24 = tpu.concatenate %20, %21, %22, %23 in 0 : vector<1x16x8xf32>, vector<1x16x8xf32>, vector<1x16x8xf32>, vector<1x16x8xf32> -> vector<4x16x8xf32>
    %25 = vector.shape_cast %24 : vector<4x16x8xf32> to vector<8x8x8xf32>
    %26 = vector.extract_strided_slice %5 {offsets = [0, 64], sizes = [16, 8], strides = [1, 1]} : vector<16x96xf32> to vector<16x8xf32>
    %27 = vector.extract_strided_slice %5 {offsets = [0, 72], sizes = [16, 8], strides = [1, 1]} : vector<16x96xf32> to vector<16x8xf32>
    %28 = vector.extract_strided_slice %5 {offsets = [0, 80], sizes = [16, 8], strides = [1, 1]} : vector<16x96xf32> to vector<16x8xf32>
    %29 = vector.extract_strided_slice %5 {offsets = [0, 88], sizes = [16, 8], strides = [1, 1]} : vector<16x96xf32> to vector<16x8xf32>
    %30 = vector.shape_cast %26 : vector<16x8xf32> to vector<1x16x8xf32>
    %31 = vector.shape_cast %27 : vector<16x8xf32> to vector<1x16x8xf32>
    %32 = vector.shape_cast %28 : vector<16x8xf32> to vector<1x16x8xf32>
    %33 = vector.shape_cast %29 : vector<16x8xf32> to vector<1x16x8xf32>
    %34 = tpu.concatenate %30, %31, %32, %33 in 0 : vector<1x16x8xf32>, vector<1x16x8xf32>, vector<1x16x8xf32>, vector<1x16x8xf32> -> vector<4x16x8xf32>
    %35 = vector.shape_cast %34 : vector<4x16x8xf32> to vector<8x8x8xf32>
    "tpu.trace_start"() <{level = 10 : i32, message = "bqd,bkd->bqk"}> : () -> ()
    %cst_5 = arith.constant dense<0.000000e+00> : vector<8x8x8xf32>
    %36 = tpu.matmul %15, %25, %cst_5 {dimension_numbers = #tpu.dot_dimension_numbers<[2], [2], [1], [1], [0, 0, 0, 1, 1, 1], [0], [0]>} : vector<8x8x8xf32>, vector<8x8x8xf32>, vector<8x8x8xf32> -> vector<8x8x8xf32>
    "tpu.trace_stop"() : () -> ()
    %cst_6 = arith.constant dense<0xFF800000> : vector<8x8xf32>
    %37 = vector.multi_reduction <maximumf>, %36, %cst_6 [2] : vector<8x8x8xf32> to vector<8x8xf32>
    %38 = vector.shape_cast %37 : vector<8x8xf32> to vector<8x8x1xf32>
    %39 = vector.broadcast %38 : vector<8x8x1xf32> to vector<8x8x8xf32>
    %40 = arith.subf %36, %39 : vector<8x8x8xf32>
    %41 = math.exp %40 : vector<8x8x8xf32>
    %cst_7 = arith.constant dense<0.000000e+00> : vector<8x8xf32>
    %42 = vector.multi_reduction <add>, %41, %cst_7 [2] : vector<8x8x8xf32> to vector<8x8xf32>
    %43 = vector.shape_cast %42 : vector<8x8xf32> to vector<8x8x1xf32>
    %44 = tpu.reciprocal %43 {approx = true} : vector<8x8x1xf32> -> vector<8x8x1xf32>
    %45 = arith.mulf %43, %44 : vector<8x8x1xf32>
    %cst_8 = arith.constant 2.000000e+00 : f32
    %46 = vector.broadcast %cst_8 : f32 to vector<8x8x1xf32>
    %47 = arith.subf %46, %45 : vector<8x8x1xf32>
    %48 = arith.mulf %44, %47 : vector<8x8x1xf32>
    %49 = vector.broadcast %48 : vector<8x8x1xf32> to vector<8x8x8xf32>
    %50 = arith.mulf %41, %49 : vector<8x8x8xf32>
    "tpu.trace_start"() <{level = 10 : i32, message = "bqk,bkd->bqd"}> : () -> ()
    %cst_9 = arith.constant dense<0.000000e+00> : vector<8x8x8xf32>
    %51 = tpu.matmul %50, %35, %cst_9 {dimension_numbers = #tpu.dot_dimension_numbers<[2], [1], [1], [2], [0, 0, 0, 1, 1, 2], [0], [0]>} : vector<8x8x8xf32>, vector<8x8x8xf32>, vector<8x8x8xf32> -> vector<8x8x8xf32>
    "tpu.trace_stop"() : () -> ()
    %52 = vector.extract_strided_slice %51 {offsets = [0, 0, 0], sizes = [2, 8, 8], strides = [1, 1, 1]} : vector<8x8x8xf32> to vector<2x8x8xf32>
    %53 = vector.shape_cast %52 : vector<2x8x8xf32> to vector<16x8xf32>
    %54 = vector.extract_strided_slice %51 {offsets = [2, 0, 0], sizes = [2, 8, 8], strides = [1, 1, 1]} : vector<8x8x8xf32> to vector<2x8x8xf32>
    %55 = vector.shape_cast %54 : vector<2x8x8xf32> to vector<16x8xf32>
    %56 = vector.extract_strided_slice %51 {offsets = [4, 0, 0], sizes = [2, 8, 8], strides = [1, 1, 1]} : vector<8x8x8xf32> to vector<2x8x8xf32>
    %57 = vector.shape_cast %56 : vector<2x8x8xf32> to vector<16x8xf32>
    %58 = vector.extract_strided_slice %51 {offsets = [6, 0, 0], sizes = [2, 8, 8], strides = [1, 1, 1]} : vector<8x8x8xf32> to vector<2x8x8xf32>
    %59 = vector.shape_cast %58 : vector<2x8x8xf32> to vector<16x8xf32>
    %60 = tpu.concatenate %53, %55, %57, %59 in 1 : vector<16x8xf32>, vector<16x8xf32>, vector<16x8xf32>, vector<16x8xf32> -> vector<16x32xf32>
    %c0_10 = arith.constant 0 : index
    %c0_11 = arith.constant 0 : index
    %61 = vector.load %arg3[%c0_10, %c0_11] : memref<32x32xf32, #tpu.memory_space<vmem>>, vector<32x32xf32>
    %cst_12 = arith.constant dense<0.000000e+00> : vector<16x32xf32>
    %62 = tpu.matmul %60, %61, %cst_12 {dimension_numbers = #tpu.dot_dimension_numbers<[1], [0], [0], [1], [0, 0, 1, 1], [], []>} : vector<16x32xf32>, vector<32x32xf32>, vector<16x32xf32> -> vector<16x32xf32>
    %c1 = arith.constant 1 : index
    %c0_13 = arith.constant 0 : index
    %63 = vector.load %arg6[%c1, %c0_13] : memref<8x96xf32, #tpu.memory_space<vmem>>, vector<1x32xf32>
    %64 = vector.broadcast %63 : vector<1x32xf32> to vector<16x32xf32>
    %65 = arith.addf %62, %64 : vector<16x32xf32>
    %c0_14 = arith.constant 0 : index
    %c0_15 = arith.constant 0 : index
    %66 = vector.load %arg1[%c0_14, %c0_15] : memref<16x32xf32, #tpu.memory_space<vmem>>, vector<16x32xf32>
    %67 = arith.addf %66, %65 : vector<16x32xf32>
    %cst_16 = arith.constant dense<0.000000e+00> : vector<16xf32>
    %68 = vector.multi_reduction <add>, %67, %cst_16 [1] : vector<16x32xf32> to vector<16xf32>
    %69 = vector.shape_cast %68 : vector<16xf32> to vector<16x1xf32>
    %cst_17 = arith.constant 3.200000e+01 : f32
    %70 = vector.broadcast %cst_17 : f32 to vector<16x1xf32>
    %71 = arith.divf %69, %70 : vector<16x1xf32>
    %72 = vector.broadcast %71 : vector<16x1xf32> to vector<16x32xf32>
    %73 = arith.subf %67, %72 : vector<16x32xf32>
    %74 = arith.mulf %73, %73 : vector<16x32xf32>
    %cst_18 = arith.constant dense<0.000000e+00> : vector<16xf32>
    %75 = vector.multi_reduction <add>, %74, %cst_18 [1] : vector<16x32xf32> to vector<16xf32>
    %76 = vector.shape_cast %75 : vector<16xf32> to vector<16x1xf32>
    %cst_19 = arith.constant 3.200000e+01 : f32
    %77 = vector.broadcast %cst_19 : f32 to vector<16x1xf32>
    %78 = arith.divf %76, %77 : vector<16x1xf32>
    %79 = vector.broadcast %71 : vector<16x1xf32> to vector<16x32xf32>
    %80 = arith.subf %67, %79 : vector<16x32xf32>
    %cst_20 = arith.constant 9.99999974E-6 : f32
    %81 = vector.broadcast %cst_20 : f32 to vector<16x1xf32>
    %82 = arith.addf %78, %81 : vector<16x1xf32>
    %83 = math.rsqrt %82 : vector<16x1xf32>
    %84 = vector.broadcast %83 : vector<16x1xf32> to vector<16x32xf32>
    %85 = arith.mulf %80, %84 : vector<16x32xf32>
    %c4 = arith.constant 4 : index
    %c0_21 = arith.constant 0 : index
    %86 = vector.load %arg6[%c4, %c0_21] : memref<8x96xf32, #tpu.memory_space<vmem>>, vector<1x32xf32>
    %87 = vector.broadcast %86 : vector<1x32xf32> to vector<16x32xf32>
    %88 = arith.mulf %85, %87 : vector<16x32xf32>
    %c5 = arith.constant 5 : index
    %c0_22 = arith.constant 0 : index
    %89 = vector.load %arg6[%c5, %c0_22] : memref<8x96xf32, #tpu.memory_space<vmem>>, vector<1x32xf32>
    %90 = vector.broadcast %89 : vector<1x32xf32> to vector<16x32xf32>
    %91 = arith.addf %88, %90 : vector<16x32xf32>
    %c0_23 = arith.constant 0 : index
    %c0_24 = arith.constant 0 : index
    %92 = vector.load %arg4[%c0_23, %c0_24] : memref<32x64xf32, #tpu.memory_space<vmem>>, vector<32x64xf32>
    %cst_25 = arith.constant dense<0.000000e+00> : vector<16x64xf32>
    %93 = tpu.matmul %91, %92, %cst_25 {dimension_numbers = #tpu.dot_dimension_numbers<[1], [0], [0], [1], [0, 0, 1, 1], [], []>} : vector<16x32xf32>, vector<32x64xf32>, vector<16x64xf32> -> vector<16x64xf32>
    %c2 = arith.constant 2 : index
    %c0_26 = arith.constant 0 : index
    %94 = vector.load %arg6[%c2, %c0_26] : memref<8x96xf32, #tpu.memory_space<vmem>>, vector<1x64xf32>
    %95 = vector.broadcast %94 : vector<1x64xf32> to vector<16x64xf32>
    %96 = arith.addf %93, %95 : vector<16x64xf32>
    %cst_27 = arith.constant 0.000000e+00 : f32
    %97 = vector.broadcast %cst_27 : f32 to vector<16x64xf32>
    %98 = arith.maximumf %96, %97 : vector<16x64xf32>
    %c0_28 = arith.constant 0 : index
    %c0_29 = arith.constant 0 : index
    %99 = vector.load %arg5[%c0_28, %c0_29] : memref<64x32xf32, #tpu.memory_space<vmem>>, vector<64x32xf32>
    %cst_30 = arith.constant dense<0.000000e+00> : vector<16x32xf32>
    %100 = tpu.matmul %98, %99, %cst_30 {dimension_numbers = #tpu.dot_dimension_numbers<[1], [0], [0], [1], [0, 0, 1, 1], [], []>} : vector<16x64xf32>, vector<64x32xf32>, vector<16x32xf32> -> vector<16x32xf32>
    %c3 = arith.constant 3 : index
    %c0_31 = arith.constant 0 : index
    %101 = vector.load %arg6[%c3, %c0_31] : memref<8x96xf32, #tpu.memory_space<vmem>>, vector<1x32xf32>
    %102 = vector.broadcast %101 : vector<1x32xf32> to vector<16x32xf32>
    %103 = arith.addf %100, %102 : vector<16x32xf32>
    %104 = arith.addf %91, %103 : vector<16x32xf32>
    %cst_32 = arith.constant dense<0.000000e+00> : vector<16xf32>
    %105 = vector.multi_reduction <add>, %104, %cst_32 [1] : vector<16x32xf32> to vector<16xf32>
    %106 = vector.shape_cast %105 : vector<16xf32> to vector<16x1xf32>
    %cst_33 = arith.constant 3.200000e+01 : f32
    %107 = vector.broadcast %cst_33 : f32 to vector<16x1xf32>
    %108 = arith.divf %106, %107 : vector<16x1xf32>
    %109 = vector.broadcast %108 : vector<16x1xf32> to vector<16x32xf32>
    %110 = arith.subf %104, %109 : vector<16x32xf32>
    %111 = arith.mulf %110, %110 : vector<16x32xf32>
    %cst_34 = arith.constant dense<0.000000e+00> : vector<16xf32>
    %112 = vector.multi_reduction <add>, %111, %cst_34 [1] : vector<16x32xf32> to vector<16xf32>
    %113 = vector.shape_cast %112 : vector<16xf32> to vector<16x1xf32>
    %cst_35 = arith.constant 3.200000e+01 : f32
    %114 = vector.broadcast %cst_35 : f32 to vector<16x1xf32>
    %115 = arith.divf %113, %114 : vector<16x1xf32>
    %116 = vector.broadcast %108 : vector<16x1xf32> to vector<16x32xf32>
    %117 = arith.subf %104, %116 : vector<16x32xf32>
    %cst_36 = arith.constant 9.99999974E-6 : f32
    %118 = vector.broadcast %cst_36 : f32 to vector<16x1xf32>
    %119 = arith.addf %115, %118 : vector<16x1xf32>
    %120 = math.rsqrt %119 : vector<16x1xf32>
    %121 = vector.broadcast %120 : vector<16x1xf32> to vector<16x32xf32>
    %122 = arith.mulf %117, %121 : vector<16x32xf32>
    %c6 = arith.constant 6 : index
    %c0_37 = arith.constant 0 : index
    %123 = vector.load %arg6[%c6, %c0_37] : memref<8x96xf32, #tpu.memory_space<vmem>>, vector<1x32xf32>
    %124 = vector.broadcast %123 : vector<1x32xf32> to vector<16x32xf32>
    %125 = arith.mulf %122, %124 : vector<16x32xf32>
    %c7 = arith.constant 7 : index
    %c0_38 = arith.constant 0 : index
    %126 = vector.load %arg6[%c7, %c0_38] : memref<8x96xf32, #tpu.memory_space<vmem>>, vector<1x32xf32>
    %127 = vector.broadcast %126 : vector<1x32xf32> to vector<16x32xf32>
    %128 = arith.addf %125, %127 : vector<16x32xf32>
    %c0_39 = arith.constant 0 : index
    %c0_40 = arith.constant 0 : index
    %129 = vector.load %arg7[%c0_39, %c0_40] : memref<16x32xf32, #tpu.memory_space<vmem>>, vector<16x32xf32>
    tpu.vector_store %arg7[%c0_39, %c0_40], %128 {strides = array<i32>} : memref<16x32xf32, #tpu.memory_space<vmem>>, vector<16x32xf32>,
    return
  }
  func.func @transform_0(%arg0: i32) -> (i32, i32) {
    %c0_i32 = arith.constant 0 : i32
    %c0_i32_0 = arith.constant 0 : i32
    return %arg0, %c0_i32 : i32, i32
  }
  func.func @transform_1(%arg0: i32) -> (i32, i32) {
    %c0_i32 = arith.constant 0 : i32
    %c0_i32_0 = arith.constant 0 : i32
    %c0_i32_1 = arith.constant 0 : i32
    return %c0_i32, %c0_i32_0 : i32, i32
  }
  func.func @transform_2(%arg0: i32) -> (i32, i32) {
    %c0_i32 = arith.constant 0 : i32
    %c0_i32_0 = arith.constant 0 : i32
    %c0_i32_1 = arith.constant 0 : i32
    return %c0_i32, %c0_i32_0 : i32, i32
  }
  func.func @transform_3(%arg0: i32) -> (i32, i32) {
    %c0_i32 = arith.constant 0 : i32
    %c0_i32_0 = arith.constant 0 : i32
    %c0_i32_1 = arith.constant 0 : i32
    return %c0_i32, %c0_i32_0 : i32, i32
  }
  func.func @transform_4(%arg0: i32) -> (i32, i32) {
    %c0_i32 = arith.constant 0 : i32
    %c0_i32_0 = arith.constant 0 : i32
    %c0_i32_1 = arith.constant 0 : i32
    return %c0_i32, %c0_i32_0 : i32, i32
  }
  func.func @transform_5(%arg0: i32) -> (i32, i32) {
    %c0_i32 = arith.constant 0 : i32
    %c0_i32_0 = arith.constant 0 : i32
    %c0_i32_1 = arith.constant 0 : i32
    return %c0_i32, %c0_i32_0 : i32, i32
  }
  func.func @transform_6(%arg0: i32) -> (i32, i32) {
    %c0_i32 = arith.constant 0 : i32
    %c0_i32_0 = arith.constant 0 : i32
    return %arg0, %c0_i32 : i32, i32
  }
}

</mosaic_0001>

<bundles_post_ra>
// kernel: transformer_self_attention_block.1
= control target key start
LH: loop header
LB: loop body
LE: loop exit
PB: predicated region body
PF: predicated region fallthrough
CT: control target
= control target key end

     0   :  { %11 = vsyncpa [#allocation3], 0  ;;  %s2629_s0 = inlined_call_operand.hbm [shape: f32[16,32], index: 0, kind: input, shape index: {}]   ;;  %s2630_s1 = inlined_call_operand.vmem [shape: f32[32,96], index: 1, kind: input, shape index: {}]   ;;  %s2631_s2 = inlined_call_operand.vmem [shape: f32[32,32], index: 2, kind: input, shape index: {}]   ;;  %s2632_s3 = inlined_call_operand.vmem [shape: f32[32,64], index: 3, kind: input, shape index: {}]   ;;  %s2633_s4 = inlined_call_operand.vmem [shape: f32[64,32], index: 4, kind: input, shape index: {}]   ;;  %s2634_s5 = inlined_call_operand.vmem [shape: f32[8,96], index: 5, kind: input, shape index: {}]   ;;  %s2635_s6 = inlined_call_operand.hbm [shape: f32[16,32], index: 6, kind: output, shape index: {}]  }
   0x1   :  { %12 = vsyncpa [#allocation4], 0  ;;  %s2262_s21 = smov [#allocation2]   ;;  %s2214_s25 = scalar_lea.hbm %s2629_s0, 256 }
   0x2   :  { %s18_s22 = sshll.u32 %s2262_s21, 4  ;;  %p2215_p0 = scmp.ne.s32.totalorder %s2629_s0, %s2214_s25  ;;  %s19_s22 = int_to_ptr.vmem [resolvable:$true] %s18_s22 }
   0x3   :  { %p2218_p1 = scmp.lt.u32.totalorder %s2214_s25, %s2629_s0 }
   0x5   :  { %p2220_p2 = pnand %p2218_p1, %p2215_p0 }
   0x7   :  { %2223 = shalt.err (!%p2220_p2)
}
   0x8   :  { %s2224_s30 = scalar_lea.vmem %s19_s22, 256  ;;  %p2229_p4 = scmp.lt.s32.totalorder %s19_s22, %s19_s22 }
   0x9   :  { %p2225_p3 = scmp.ne.s32.totalorder %s19_s22, %s2224_s30  ;;  %p2230_p5 = scmp.lt.s32.totalorder %s2224_s30, %s2224_s30 }
   0xb   :  { %p2231_p6 = por %p2230_p5, %p2229_p4 }
   0xd   :  { %p2232_p7 = pnand %p2231_p6, %p2225_p3 }
   0xf   :  { %2235 = shalt.err (!%p2232_p7)
}
  0x10   :  { %s2263_s7 = smov 128   ;;  %s2264_s8 = smov 8  }
  0x11   :  { %24 = dma.hbm_to_vmem [thread:$0]  %s2629_s0, 256, %s19_s22, [#allocation3], %s2263_s7, %s2263_s7, %s2264_s8  }
  0x12   :  { %2258 = dma.done.wait [#allocation3], 256  }
  0x13   :  { %2259 = vsyncadd [#allocation3], 4294967040  ;;  %vm49_vm0 = vcmask 261120   ;;  %v40_v0 = vld [vmem:[%s2630_s1] sm:$0xff]  ;;  %v41_v1 = vld [vmem:[%s2630_s1 + $0x8] sm:$0xff]  ;;  %v2265_v10 = vmov 0.0  }
  0x14   :  { %v42_v2 = vld [vmem:[%s2630_s1 + $0x10] sm:$0xff]  ;;  %v2121_v3 = vpack.c.bf16 %v41_v1, %v40_v0  ;;  %v43_v4 = vld [vmem:[%s2630_s1 + $0x18] sm:$0xff]  ;;  %v2337_v5 = vld [vmem:[#allocation2] sm:$0xff]  ;;  %2010 = vmatprep.subr.mxu0 %v2265_v10  ;;  %s2266_s1 = smov 112   ;;  %s2267_s20 = smov 120   ;;  %vm2268_vm1 = vmmov 0  }
  0x15   :  { %v2125_v6 = vpack.c.bf16 %v43_v4, %v42_v2  ;;  %1997 = vmatprep.mubr.msk.f32.mxu1 %vm49_vm0, %v2337_v5  ;;  %v2341_v7 = vld [vmem:[#allocation2 + $0x8] sm:$0xff]  ;;  %v1889_v8 = vld [vmem:[%s2634_s5] ss:$0 sm:$0xff]  ;;  %2012 = vmatprep.mubr.msk.f32.mxu0 %vm2268_vm1, %v2265_v10  ;;  %s2269_s21 = smov 104   ;;  %s2270_s22 = smov 96   ;;  %vm147_vm2 = vcmask 64512  }
  0x16   :  { %2122 = vmatprep.subr.bf16.mxu1 %v2121_v3  ;;  %s2271_s23 = smov 64   ;;  %s2272_s10 = smov 16   ;;  %vm1500_vm3 = vcmask 130048   ;;  %vm1503_vm4 = vcmask 195584   ;;  %vm1746_vm5 = vcmask 523264  }
  0x17   :  { %2124 = vmatpush3.bf16.msra.mxu1 %v2121_v3  ;;  %s2273_s11 = smov 24  }
  0x18   :  { %2126 = vmatprep.subr.bf16.mxu1 %v2125_v6 }
  0x1b   :  { %2128 = vmatpush3.bf16.msra.mxu1 %v2125_v6 }
  0x1c   :  { %2000 = vmatprep.subr.mxu1 %v2265_v10 }
  0x1e   :  { %1998 = vmatmul.mubr.msk.f32.vlgmr.msra.gmra.mrb[0].mxu1 %vm49_vm0, %v2341_v7 }
  0x1f   :  { %2002 = vmatprep.mubr.msk.f32.mxu1 %vm2268_vm1, %v2265_v10 }
  0xf1   :  { %v1999_v9 = vpop.f32.mrb[0].mxu1 }
  0xf2   :  { %v122_v11 = vpop.f32.mrb[1].mxu1  ;;  %v2358_v13 = vadd.f32 %v1999_v9, %v1889_v8 }
  0xf3   :  { %v2350_v12 = vadd.f32 %v1889_v8, %v122_v11 }
  0xf5   :  { %137 = vrot.lane.b32.xlu1 %v2350_v12, %s2266_s1  ;;  %133 = vrot.lane.b32.xlu0 %v2350_v12, %s2267_s20 }
  0xf9   :  { %139 = vrot.lane.b32.xlu1 %v2358_v13, %s2266_s1  ;;  %135 = vrot.lane.b32.xlu0 %v2358_v13, %s2267_s20  ;;  %s2274_s20 = smov [#allocation5]  }
  0xfd   :  { %143 = vrot.lane.b32.xlu1 %v2358_v13, %s2269_s21  ;;  %141 = vrot.lane.b32.xlu0 %v2350_v12, %s2269_s21  ;;  %s1877_s21 = sshll.u32 %s2274_s20, 4  ;;  %s1878_s21 = int_to_ptr.vmem [resolvable:$true] %s1877_s21 }
  0xfe   :  { %p2241_p9 = scmp.lt.s32.totalorder %s1878_s21, %s1878_s21 }
 0x101   :  { %222 = vrot.lane.b32.xlu1 %v2358_v13, %s2270_s22  ;;  %145 = vrot.lane.b32.xlu0 %v2350_v12, %s2270_s22 }
 0x167   :  { %v2366_v14 = vpop.permute.xlu1 %137  ;;  %v2368_v15 = vpop.permute.xlu0 %133 }
 0x168   :  { %298 = vrot.lane.b32.xlu0 %v2368_v15, %s2270_s22 }
 0x16b   :  { %v2371_v16 = vpop.permute.xlu1 %139  ;;  %v2373_v17 = vpop.permute.xlu0 %135 }
 0x16c   :  { %450 = vrot.lane.b32.xlu0 %v2366_v14, %s2270_s22  ;;  %374 = vrot.lane.b32.xlu1 %v2373_v17, %s2270_s22 }
 0x16f   :  { %v2377_v18 = vpop.permute.xlu0 %141  ;;  %v2381_v19 = vpop.permute.xlu1 %143 }
 0x170   :  { %526 = vrot.lane.b32.xlu1 %v2371_v16, %s2270_s22  ;;  %602 = vrot.lane.b32.xlu0 %v2377_v18, %s2270_s22 }
 0x173   :  { %v146_v20 = vpop.permute.xlu0 %145  ;;  %v223_v21 = vpop.permute.xlu1 %222 }
 0x174   :  { %678 = vrot.lane.b32.xlu1 %v2381_v19, %s2270_s22  ;;  %2001 = vmatpush3.xpose.msk.msra.mxu1 %vm147_vm2, %v146_v20  ;;  %s2236_s22 = scalar_lea.vmem %s1878_s21, 256 }
 0x175   :  { %2005 = vmatprep.subr.mxu1 %v2265_v10  ;;  %p2237_p8 = scmp.ne.s32.totalorder %s1878_s21, %s2236_s22  ;;  %p2242_p10 = scmp.lt.s32.totalorder %s2236_s22, %s2236_s22 }
 0x177   :  { %2003 = vmatmul.mubr.msk.f32.vlgmr.msra.gmra.mrb[2].mxu1 %vm147_vm2, %v2350_v12  ;;  %p2243_p11 = por %p2242_p10, %p2241_p9 }
 0x178   :  { %2006 = vmatpush3.xpose.msk.msra.mxu1 %vm147_vm2, %v223_v21  ;;  %2007 = vmatprep.mubr.msk.f32.mxu1 %vm2268_vm1, %v2265_v10 }
 0x179   :  { %2015 = vmatprep.subr.mxu1 %v2265_v10  ;;  %p2244_p12 = pnand %p2243_p11, %p2237_p8 }
 0x17b   :  { %2008 = vmatmul.mubr.msk.f32.vlgmr.msra.gmra.mrb[4].mxu1 %vm147_vm2, %v2358_v13 }
 0x17c   :  { %2017 = vmatprep.mubr.msk.f32.mxu1 %vm2268_vm1, %v2265_v10 }
 0x1da   :  { %v299_v22 = vpop.permute.xlu0 %298 }
 0x1db   :  { %2011 = vmatpush3.xpose.msk.msra.mxu0 %vm147_vm2, %v299_v22 }
 0x1dc   :  { %2020 = vmatprep.subr.mxu0 %v2265_v10 }
 0x1de   :  { %v375_v23 = vpop.permute.xlu1 %374  ;;  %2013 = vmatmul.mubr.msk.f32.vlgmr.msra.gmra.mrb[0].mxu0 %vm147_vm2, %v2368_v15  ;;  %v451_v24 = vpop.permute.xlu0 %450 }
 0x1df   :  { %2016 = vmatpush3.xpose.msk.msra.mxu1 %vm147_vm2, %v375_v23  ;;  %2021 = vmatpush3.xpose.msk.msra.mxu0 %vm147_vm2, %v451_v24 }
 0x1e0   :  { %2022 = vmatprep.mubr.msk.f32.mxu0 %vm2268_vm1, %v2265_v10  ;;  %2025 = vmatprep.subr.mxu1 %v2265_v10 }
 0x1e1   :  { %2030 = vmatprep.subr.mxu0 %v2265_v10 }
 0x1e2   :  { %v527_v25 = vpop.permute.xlu1 %526  ;;  %2018 = vmatmul.mubr.msk.f32.vlgmr.msra.gmra.mrb[6].mxu1 %vm147_vm2, %v2373_v17  ;;  %2023 = vmatmul.mubr.msk.f32.vlgmr.msra.gmra.mrb[2].mxu0 %vm147_vm2, %v2366_v14  ;;  %v603_v26 = vpop.permute.xlu0 %602 }
 0x1e3   :  { %2026 = vmatpush3.xpose.msk.msra.mxu1 %vm147_vm2, %v527_v25  ;;  %2031 = vmatpush3.xpose.msk.msra.mxu0 %vm147_vm2, %v603_v26 }
 0x1e4   :  { %2027 = vmatprep.mubr.msk.f32.mxu1 %vm2268_vm1, %v2265_v10  ;;  %2032 = vmatprep.mubr.msk.f32.mxu0 %vm2268_vm1, %v2265_v10 }
 0x1e5   :  { %2035 = vmatprep.subr.mxu1 %v2265_v10  ;;  %2040 = vmatprep.subr.mxu0 %v2265_v10 }
 0x1e6   :  { %v679_v27 = vpop.permute.xlu1 %678  ;;  %2028 = vmatmul.mubr.msk.f32.vlgmr.msra.gmra.mrb[8].mxu1 %vm147_vm2, %v2371_v16  ;;  %2033 = vmatmul.mubr.msk.f32.vlgmr.msra.gmra.mrb[4].mxu0 %vm147_vm2, %v2377_v18 }
 0x1e7   :  { %2036 = vmatpush3.xpose.msk.msra.mxu1 %vm147_vm2, %v679_v27  ;;  %2037 = vmatprep.mubr.msk.f32.mxu1 %vm2268_vm1, %v2265_v10 }
 0x1e8   :  { %2045 = vmatprep.subr.mxu1 %v2265_v10  ;;  %2042 = vmatprep.mubr.msk.f32.mxu0 %vm2268_vm1, %v2265_v10 }
 0x1ea   :  { %2038 = vmatmul.mubr.msk.f32.vlgmr.msra.gmra.mrb[10].mxu1 %vm147_vm2, %v2381_v19 }
 0x1eb   :  { %2047 = vmatprep.mubr.msk.f32.mxu1 %vm2268_vm1, %v2265_v10 }
 0x24a   :  { %v218_v28 = vpop.f32.mrb[2].mxu1 }
 0x24b   :  { %v2004_v29 = vpop.f32.mrb[3].mxu1  ;;  %v754_v30 = vsel %vm147_vm2, %v218_v28, -inf }
 0x24c   :  { %755 = vmax.xlane.f32.xlu0 %v754_v30 }
 0x24e   :  { %v294_v31 = vpop.f32.mrb[4].mxu1 }
 0x24f   :  { %v2009_v32 = vpop.f32.mrb[5].mxu1  ;;  %v757_v33 = vsel %vm147_vm2, %v294_v31, -inf }
 0x250   :  { %758 = vmax.xlane.f32.xlu1 %v757_v33 }
 0x2b1   :  { %v370_v34 = vpop.f32.mrb[0].mxu0 }
 0x2b2   :  { %v2014_v35 = vpop.f32.mrb[1].mxu0  ;;  %v760_v36 = vsel %vm147_vm2, %v370_v34, -inf }
 0x2b3   :  { %761 = vmax.xlane.f32.xlu0 %v760_v36 }
 0x2b5   :  { %v446_v37 = vpop.f32.mrb[6].mxu1  ;;  %v522_v38 = vpop.f32.mrb[2].mxu0 }
 0x2b6   :  { %v2019_v39 = vpop.f32.mrb[7].mxu1  ;;  %v2024_v40 = vpop.f32.mrb[3].mxu0  ;;  %v763_v41 = vsel %vm147_vm2, %v446_v37, -inf  ;;  %v766_v42 = vsel %vm147_vm2, %v522_v38, -inf }
 0x2b7   :  { %764 = vmax.xlane.f32.xlu0 %v763_v41  ;;  %767 = vmax.xlane.f32.xlu1 %v766_v42 }
 0x2b9   :  { %v598_v43 = vpop.f32.mrb[8].mxu1  ;;  %v674_v44 = vpop.f32.mrb[4].mxu0 }
 0x2ba   :  { %v2029_v45 = vpop.f32.mrb[9].mxu1  ;;  %v2034_v46 = vpop.f32.mrb[5].mxu0  ;;  %v769_v47 = vsel %vm147_vm2, %v598_v43, -inf  ;;  %v772_v48 = vsel %vm147_vm2, %v674_v44, -inf }
 0x2bb   :  { %770 = vmax.xlane.f32.xlu0 %v769_v47  ;;  %773 = vmax.xlane.f32.xlu1 %v772_v48 }
 0x2bd   :  { %v750_v49 = vpop.f32.mrb[10].mxu1 }
 0x2be   :  { %v2039_v50 = vpop.f32.mrb[11].mxu1  ;;  %v775_v51 = vsel %vm147_vm2, %v750_v49, -inf }
 0x2bf   :  { %776 = vmax.xlane.f32.xlu0 %v775_v51 }
 0x2cc   :  { %866 = vrot.lane.b32.xlu1 %v2350_v12, %s2271_s23 }
 0x2d0   :  { %1018 = vrot.lane.b32.xlu1 %v2368_v15, %s2271_s23 }
 0x2d4   :  { %1094 = vrot.lane.b32.xlu1 %v2373_v17, %s2271_s23 }
 0x2d5   :  { %942 = vrot.lane.b32.xlu0 %v2358_v13, %s2271_s23 }
 0x2d8   :  { %1246 = vrot.lane.b32.xlu1 %v2371_v16, %s2271_s23 }
 0x2d9   :  { %1170 = vrot.lane.b32.xlu0 %v2366_v14, %s2271_s23  ;;  %v756_v54 = vpop.xlane.xlu0 %755 }
 0x2da   :  { %v778_v55 = vsub.f32 %v218_v28, %v756_v54 }
 0x2dc   :  { %v786_v57 = vmul.f32 1.442695, %v778_v55 }
 0x2dd   :  { %v759_v52 = vpop.xlane.xlu1 %758 }
 0x2de   :  { %v779_v53 = vsub.f32 %v294_v31, %v759_v52 }
 0x2e0   :  { %v788_v56 = vmul.f32 1.442695, %v779_v53 }
 0x2e2   :  { %2174 = vpow2.f32 %v788_v56 }
 0x2e3   :  { %2176 = vpow2.f32 %v786_v57 }
 0x2ec   :  { %v2452_v58 = vpop.eup %2174 }
 0x2ed   :  { %v805_v59 = vsel %vm147_vm2, %v2452_v58, 0.0  ;;  %v2456_v60 = vpop.eup %2176 }
 0x2ee   :  { %v802_v61 = vsel %vm147_vm2, %v2456_v60, 0.0 }
 0x2f8   :  { %806 = vadd.xlane.f32.xlu0 %v805_v59 }
 0x2fc   :  { %803 = vadd.xlane.f32.xlu1 %v802_v61 }
 0x340   :  { %v762_v62 = vpop.xlane.xlu0 %761 }
 0x341   :  { %v780_v63 = vsub.f32 %v370_v34, %v762_v62 }
 0x343   :  { %v790_v0 = vmul.f32 1.442695, %v780_v63 }
 0x344   :  { %v768_v1 = vpop.xlane.xlu1 %767  ;;  %v765_v2 = vpop.xlane.xlu0 %764 }
 0x345   :  { %2178 = vpow2.f32 %v790_v0  ;;  %v782_v3 = vsub.f32 %v522_v38, %v768_v1  ;;  %v781_v4 = vsub.f32 %v446_v37, %v765_v2 }
 0x347   :  { %v794_v6 = vmul.f32 1.442695, %v782_v3  ;;  %v792_v8 = vmul.f32 1.442695, %v781_v4 }
 0x348   :  { %v774_v9 = vpop.xlane.xlu1 %773  ;;  %v771_v11 = vpop.xlane.xlu0 %770 }
 0x349   :  { %2180 = vpow2.f32 %v794_v6  ;;  %v784_v12 = vsub.f32 %v674_v44, %v774_v9  ;;  %v783_v13 = vsub.f32 %v598_v43, %v771_v11 }
 0x34a   :  { %2182 = vpow2.f32 %v792_v8 }
 0x34b   :  { %v798_v14 = vmul.f32 1.442695, %v784_v12  ;;  %v796_v15 = vmul.f32 1.442695, %v783_v13 }
 0x34c   :  { %v867_v16 = vpop.permute.xlu1 %866  ;;  %v777_v17 = vpop.xlane.xlu0 %776 }
 0x34d   :  { %2184 = vpow2.f32 %v798_v14  ;;  %v785_v20 = vsub.f32 %v750_v49, %v777_v17  ;;  %2041 = vmatpush3.msra.mxu0 %v867_v16 }
 0x34e   :  { %2186 = vpow2.f32 %v796_v15  ;;  %2050 = vmatprep.subr.mxu0 %v2265_v10 }
 0x34f   :  { %v2461_v21 = vpop.eup %2178  ;;  %v800_v22 = vmul.f32 1.442695, %v785_v20 }
 0x350   :  { %v943_v23 = vpop.permute.xlu0 %942  ;;  %v808_v24 = vsel %vm147_vm2, %v2461_v21, 0.0  ;;  %v1019_v35 = vpop.permute.xlu1 %1018 }
 0x351   :  { %2188 = vpow2.f32 %v800_v22  ;;  %809 = vadd.xlane.f32.xlu1 %v808_v24  ;;  %2046 = vmatpush3.msra.mxu1 %v943_v23 }
 0x352   :  { %2055 = vmatprep.subr.mxu1 %v2265_v10 }
 0x353   :  { %v2466_v25 = vpop.eup %2180 }
 0x354   :  { %v2468_v26 = vpop.eup %2182  ;;  %v814_v27 = vsel %vm147_vm2, %v2466_v25, 0.0  ;;  %v1095_v36 = vpop.permute.xlu1 %1094 }
 0x355   :  { %815 = vadd.xlane.f32.xlu1 %v814_v27  ;;  %v811_v28 = vsel %vm147_vm2, %v2468_v26, 0.0  ;;  %v1171_v37 = vpop.permute.xlu0 %1170 }
 0x356   :  { %812 = vadd.xlane.f32.xlu0 %v811_v28 }
 0x357   :  { %v2474_v29 = vpop.eup %2184 }
 0x358   :  { %v2476_v30 = vpop.eup %2186  ;;  %v820_v31 = vsel %vm147_vm2, %v2474_v29, 0.0  ;;  %v2490_v38 = vpop.permute.xlu1 %1246 }
 0x359   :  { %821 = vadd.xlane.f32.xlu1 %v820_v31  ;;  %v817_v32 = vsel %vm147_vm2, %v2476_v30, 0.0 }
 0x35a   :  { %818 = vadd.xlane.f32.xlu0 %v817_v32  ;;  %v1506_v32 = vld [vmem:[%s2631_s2] sm:$0xff] }
 0x35b   :  { %v2482_v33 = vpop.eup %2188 }
 0x35c   :  { %v823_v34 = vsel %vm147_vm2, %v2482_v33, 0.0 }
 0x35e   :  { %824 = vadd.xlane.f32.xlu0 %v823_v34  ;;  %v1507_v34 = vld [vmem:[%s2631_s2 + $0x8] sm:$0xff] }
 0x36a   :  { %1398 = vrot.lane.b32.xlu1 %v2381_v19, %s2271_s23 }
 0x374   :  { %1322 = vrot.lane.b32.xlu0 %v2377_v18, %s2271_s23 }
 0x385   :  { %v807_v39 = vpop.xlane.xlu0 %806 }
 0x386   :  { %2190 = vrcp.f32 %v807_v39 }
 0x389   :  { %v804_v40 = vpop.xlane.xlu1 %803 }
 0x38a   :  { %2192 = vrcp.f32 %v804_v40 }
 0x390   :  { %v2191_v41 = vpop.eup %2190 }
 0x391   :  { %v835_v42 = vmul.f32 %v2191_v41, %v807_v39 }
 0x393   :  { %v843_v43 = vsub.f32 2.0, %v835_v42 }
 0x394   :  { %v2193_v44 = vpop.eup %2192 }
 0x395   :  { %v851_v45 = vmul.f32 %v2191_v41, %v843_v43  ;;  %v834_v46 = vmul.f32 %v2193_v44, %v804_v40 }
 0x397   :  { %v859_v19 = vmul.f32 %v2452_v58, %v851_v45  ;;  %v842_v47 = vsub.f32 2.0, %v834_v46 }
 0x399   :  { %v850_v48 = vmul.f32 %v2193_v44, %v842_v47  ;;  %2048 = vmatmul.mubr.msk.f32.vlgmr.msra.gmra.mrb[12].mxu1 %vm147_vm2, %v859_v19 }
 0x39a   :  { %2056 = vmatpush3.msra.mxu1 %v1095_v36  ;;  %2057 = vmatprep.mubr.msk.f32.mxu1 %vm2268_vm1, %v2265_v10 }
 0x39b   :  { %v858_v18 = vmul.f32 %v2456_v60, %v850_v48  ;;  %2065 = vmatprep.subr.mxu1 %v2265_v10 }
 0x39d   :  { %2043 = vmatmul.mubr.msk.f32.vlgmr.msra.gmra.mrb[6].mxu0 %vm147_vm2, %v858_v18 }
 0x39e   :  { %2051 = vmatpush3.msra.mxu0 %v1019_v35  ;;  %2052 = vmatprep.mubr.msk.f32.mxu0 %vm2268_vm1, %v2265_v10  ;;  %v2129_v35 = vpack.c.bf16 %v1507_v34, %v1506_v32 }
 0x39f   :  { %2060 = vmatprep.subr.mxu0 %v2265_v10 }
 0x3de   :  { %v810_v49 = vpop.xlane.xlu1 %809 }
 0x3df   :  { %2194 = vrcp.f32 %v810_v49 }
 0x3e2   :  { %v816_v50 = vpop.xlane.xlu1 %815 }
 0x3e3   :  { %2196 = vrcp.f32 %v816_v50  ;;  %v813_v51 = vpop.xlane.xlu0 %812 }
 0x3e4   :  { %2198 = vrcp.f32 %v813_v51 }
 0x3e6   :  { %v822_v52 = vpop.xlane.xlu1 %821 }
 0x3e7   :  { %2200 = vrcp.f32 %v822_v52  ;;  %v819_v53 = vpop.xlane.xlu0 %818 }
 0x3e8   :  { %2202 = vrcp.f32 %v819_v53 }
 0x3e9   :  { %v2195_v54 = vpop.eup %2194 }
 0x3ea   :  { %v836_v55 = vmul.f32 %v2195_v54, %v810_v49 }
 0x3eb   :  { %v825_v56 = vpop.xlane.xlu0 %824 }
 0x3ec   :  { %v844_v57 = vsub.f32 2.0, %v836_v55  ;;  %2204 = vrcp.f32 %v825_v56 }
 0x3ed   :  { %v2197_v58 = vpop.eup %2196 }
 0x3ee   :  { %v2199_v59 = vpop.eup %2198  ;;  %v852_v60 = vmul.f32 %v2195_v54, %v844_v57  ;;  %v838_v61 = vmul.f32 %v2197_v58, %v816_v50 }
 0x3ef   :  { %v837_v62 = vmul.f32 %v2199_v59, %v813_v51  ;;  %v1323_v17 = vpop.permute.xlu0 %1322 }
 0x3f0   :  { %v860_v63 = vmul.f32 %v2461_v21, %v852_v60  ;;  %v846_v0 = vsub.f32 2.0, %v838_v61 }
 0x3f1   :  { %v2201_v1 = vpop.eup %2200  ;;  %v845_v2 = vsub.f32 2.0, %v837_v62 }
 0x3f2   :  { %v2203_v3 = vpop.eup %2202  ;;  %v854_v4 = vmul.f32 %v2197_v58, %v846_v0  ;;  %v840_v6 = vmul.f32 %v2201_v1, %v822_v52  ;;  %2053 = vmatmul.mubr.msk.f32.vlgmr.msra.gmra.mrb[8].mxu0 %vm147_vm2, %v860_v63 }
 0x3f3   :  { %v853_v8 = vmul.f32 %v2199_v59, %v845_v2  ;;  %v839_v9 = vmul.f32 %v2203_v3, %v819_v53  ;;  %2061 = vmatpush3.msra.mxu0 %v1171_v37  ;;  %2062 = vmatprep.mubr.msk.f32.mxu0 %vm2268_vm1, %v2265_v10  ;;  %v1916_v59 = vld [vmem:[%s2634_s5 + $0x1] ss:$0 sm:$0xff] }
 0x3f4   :  { %v862_v11 = vmul.f32 %v2466_v25, %v854_v4  ;;  %v848_v12 = vsub.f32 2.0, %v840_v6  ;;  %2070 = vmatprep.subr.mxu0 %v2265_v10  ;;  %v1399_v25 = vpop.permute.xlu1 %1398 }
 0x3f5   :  { %v861_v13 = vmul.f32 %v2468_v26, %v853_v8  ;;  %v847_v14 = vsub.f32 2.0, %v839_v9 }
 0x3f6   :  { %v2205_v15 = vpop.eup %2204  ;;  %v856_v16 = vmul.f32 %v2201_v1, %v848_v12  ;;  %2063 = vmatmul.mubr.msk.f32.vlgmr.msra.gmra.mrb[10].mxu0 %vm147_vm2, %v862_v11 }
 0x3f7   :  { %v855_v20 = vmul.f32 %v2203_v3, %v847_v14  ;;  %v841_v21 = vmul.f32 %v2205_v15, %v825_v56  ;;  %2058 = vmatmul.mubr.msk.f32.vlgmr.msra.gmra.mrb[14].mxu1 %vm147_vm2, %v861_v13  ;;  %2071 = vmatpush3.msra.mxu0 %v1323_v17 }
 0x3f8   :  { %v864_v22 = vmul.f32 %v2474_v29, %v856_v16  ;;  %2066 = vmatpush3.msra.mxu1 %v2490_v38  ;;  %2067 = vmatprep.mubr.msk.f32.mxu1 %vm2268_vm1, %v2265_v10  ;;  %v1642_v16 = vld [vmem:[%s2632_s3 + $0x8] sm:$0xff] }
 0x3f9   :  { %v863_v23 = vmul.f32 %v2476_v30, %v855_v20  ;;  %v849_v24 = vsub.f32 2.0, %v841_v21  ;;  %2072 = vmatprep.mubr.msk.f32.mxu0 %vm2268_vm1, %v2265_v10  ;;  %2075 = vmatprep.subr.mxu1 %v2265_v10  ;;  %v1643_v20 = vld [vmem:[%s2632_s3 + $0x10] sm:$0xff]  ;;  %v1644_v21 = vld [vmem:[%s2632_s3 + $0x18] sm:$0xff] }
 0x3fa   :  { %2073 = vmatmul.mubr.msk.f32.vlgmr.msra.gmra.mrb[12].mxu0 %vm147_vm2, %v864_v22  ;;  %2130 = vmatprep.subr.bf16.mxu0 %v2129_v35  ;;  %v2141_v22 = vpack.c.bf16 %v1644_v21, %v1643_v20  ;;  %v1927_v20 = vld [vmem:[%s2634_s5 + $0x6] ss:$0 sm:$0xff] }
 0x3fb   :  { %v857_v26 = vmul.f32 %v2205_v15, %v849_v24  ;;  %2068 = vmatmul.mubr.msk.f32.vlgmr.msra.gmra.mrb[16].mxu1 %vm147_vm2, %v863_v23  ;;  %2132 = vmatpush3.bf16.msra.mxu0 %v2129_v35  ;;  %v1733_v23 = vld [vmem:[%s2633_s4] sm:$0xff]  ;;  %v1734_v24 = vld [vmem:[%s2633_s4 + $0x8] sm:$0xff] }
 0x3fc   :  { %2076 = vmatpush3.msra.mxu1 %v1399_v25  ;;  %2077 = vmatprep.mubr.msk.f32.mxu1 %vm2268_vm1, %v2265_v10  ;;  %v1508_v10 = vld [vmem:[%s2631_s2 + $0x10] sm:$0xff] }
 0x3fd   :  { %v865_v27 = vmul.f32 %v2482_v33, %v857_v26  ;;  %v1509_v33 = vld [vmem:[%s2631_s2 + $0x18] sm:$0xff]  ;;  %v1735_v25 = vld [vmem:[%s2633_s4 + $0x10] sm:$0xff]  ;;  %v2145_v26 = vpack.c.bf16 %v1734_v24, %v1733_v23  ;;  %v1928_v24 = vld [vmem:[%s2634_s5 + $0x7] ss:$0 sm:$0xff] }
 0x3fe   :  { %v2133_v36 = vpack.c.bf16 %v1509_v33, %v1508_v10 }
 0x3ff   :  { %2078 = vmatmul.mubr.msk.f32.vlgmr.msra.gmra.mrb[18].mxu1 %vm147_vm2, %v865_v27  ;;  %v1736_v27 = vld [vmem:[%s2633_s4 + $0x18] sm:$0xff] }
 0x400   :  { %2134 = vmatprep.subr.bf16.mxu0 %v2133_v36 }
 0x401   :  { %2136 = vmatpush3.bf16.msra.mxu0 %v2133_v36 }
 0x402   :  { %2146 = vmatprep.subr.bf16.mxu0 %v2145_v26 }
 0x46c   :  { %v1014_v28 = vpop.f32.mrb[12].mxu1 }
 0x46d   :  { %v2049_v29 = vpop.f32.mrb[13].mxu1 }
 0x46e   :  { %v1737_v29 = vld [vmem:[%s2633_s4 + $0x20] sm:$0xff] }
 0x470   :  { %v938_v30 = vpop.f32.mrb[6].mxu0 }
 0x471   :  { %v2044_v31 = vpop.f32.mrb[7].mxu0 }
 0x4c5   :  { %v1090_v37 = vpop.f32.mrb[8].mxu0 }
 0x4c6   :  { %v2054_v38 = vpop.f32.mrb[9].mxu0  ;;  %1476 = vrot.lane.b32.xlu0 %v1090_v37, %s2264_s8 }
 0x4c7   :  { %v1919_v38 = vld [vmem:[%s2634_s5 + $0x4] ss:$0 sm:$0xff] }
 0x4c9   :  { %v1242_v39 = vpop.f32.mrb[10].mxu0 }
 0x4ca   :  { %v1166_v40 = vpop.f32.mrb[14].mxu1  ;;  %1484 = vrot.lane.b32.xlu0 %v1242_v39, %s2272_s10  ;;  %v2064_v41 = vpop.f32.mrb[11].mxu0 }
 0x4cb   :  { %1478 = vrot.lane.b32.xlu1 %v1166_v40, %s2264_s8  ;;  %v2059_v42 = vpop.f32.mrb[15].mxu1  ;;  %v1920_v40 = vld [vmem:[%s2634_s5 + $0x5] ss:$0 sm:$0xff] }
 0x4cd   :  { %v1394_v43 = vpop.f32.mrb[12].mxu0 }
 0x4ce   :  { %v1318_v44 = vpop.f32.mrb[16].mxu1  ;;  %1492 = vrot.lane.b32.xlu0 %v1394_v43, %s2273_s11  ;;  %v2074_v45 = vpop.f32.mrb[13].mxu0 }
 0x4cf   :  { %1486 = vrot.lane.b32.xlu1 %v1318_v44, %s2272_s10  ;;  %v2069_v46 = vpop.f32.mrb[17].mxu1 }
 0x4d2   :  { %v1470_v19 = vpop.f32.mrb[18].mxu1 }
 0x4d3   :  { %1494 = vrot.lane.b32.xlu1 %v1470_v19, %s2273_s11  ;;  %v2079_v47 = vpop.f32.mrb[19].mxu1  ;;  %v1739_v19 = vld [vmem:[%s2633_s4 + $0x30] sm:$0xff] }
 0x4d4   :  { %v1740_v47 = vld [vmem:[%s2633_s4 + $0x38] sm:$0xff] }
 0x538   :  { %v1477_v48 = vpop.permute.xlu0 %1476 }
 0x539   :  { %v1498_v50 = vsel %vm147_vm2, %v938_v30, %v1477_v48  ;;  %v1738_v30 = vld [vmem:[%s2633_s4 + $0x28] sm:$0xff]  ;;  %v2157_v48 = vpack.c.bf16 %v1740_v47, %v1739_v19 }
 0x53a   :  { %v2153_v31 = vpack.c.bf16 %v1738_v30, %v1737_v29 }
 0x53c   :  { %v1485_v18 = vpop.permute.xlu0 %1484 }
 0x53d   :  { %v1479_v49 = vpop.permute.xlu1 %1478  ;;  %v1501_v51 = vsel %vm1500_vm3, %v1498_v50, %v1485_v18  ;;  %v1921_v18 = vld [vmem:[%s2634_s5 + $0x2] ss:$0 sm:$0xff] }
 0x53e   :  { %v1499_v55 = vsel %vm147_vm2, %v1014_v28, %v1479_v49  ;;  %v2149_v28 = vpack.c.bf16 %v1736_v27, %v1735_v25 }
 0x540   :  { %v1493_v52 = vpop.permute.xlu0 %1492 }
 0x541   :  { %v1487_v53 = vpop.permute.xlu1 %1486  ;;  %v1504_v54 = vsel %vm1503_vm4, %v1501_v51, %v1493_v52 }
 0x542   :  { %2088 = vmatprep.mubr.msk.f32.mxu0 %vm49_vm0, %v1504_v54  ;;  %v1502_v56 = vsel %vm1500_vm3, %v1499_v55, %v1487_v53  ;;  %v1924_v55 = vld [vmem:[%s2634_s5 + $0x3] ss:$0 sm:$0xff] }
 0x545   :  { %v1495_v57 = vpop.permute.xlu1 %1494 }
 0x546   :  { %v1505_v58 = vsel %vm1503_vm4, %v1502_v56, %v1495_v57 }
 0x547   :  { %2089 = vmatmul.mubr.msk.f32.vlgmr.msra.gmra.mrb[14].mxu0 %vm49_vm0, %v1505_v58 }
 0x548   :  { %2148 = vmatpush3.bf16.msra.mxu0 %v2145_v26 }
 0x549   :  { %2150 = vmatprep.subr.bf16.mxu0 %v2149_v28 }
 0x54c   :  { %2152 = vmatpush3.bf16.msra.mxu0 %v2149_v28 }
 0x54d   :  { %2154 = vmatprep.subr.bf16.mxu0 %v2153_v31 }
 0x550   :  { %2156 = vmatpush3.bf16.msra.mxu0 %v2153_v31 }
 0x551   :  { %2158 = vmatprep.subr.bf16.mxu0 %v2157_v48 }
 0x554   :  { %2160 = vmatpush3.bf16.msra.mxu0 %v2157_v48 }
 0x61a   :  { %v2090_v60 = vpop.f32.mrb[14].mxu0 }
 0x61b   :  { %v1593_v61 = vadd.f32 %v2090_v60, %v1916_v59  ;;  %v1587_v62 = vpop.f32.mrb[15].mxu0 }
 0x61c   :  { %v1588_v63 = vadd.f32 %v1916_v59, %v1587_v62 }
 0x61d   :  { %v1599_v0 = vadd.f32 %v1593_v61, %v2341_v7 }
 0x61e   :  { %v1598_v1 = vadd.f32 %v1588_v63, %v2337_v5  ;;  %v1641_v5 = vld [vmem:[%s2632_s3] sm:$0xff] }
 0x61f   :  { %v1603_v2 = vsel %vm49_vm0, %v1599_v0, 0.0  ;;  %v2137_v17 = vpack.c.bf16 %v1642_v16, %v1641_v5 }
 0x620   :  { %1604 = vadd.xlane.f32.xlu1 %v1603_v2  ;;  %v1600_v3 = vsel %vm49_vm0, %v1598_v1, 0.0 }
 0x621   :  { %1601 = vadd.xlane.f32.xlu0 %v1600_v3  ;;  %2138 = vmatprep.subr.bf16.mxu1 %v2137_v17 }
 0x622   :  { %2140 = vmatpush3.bf16.msra.mxu1 %v2137_v17 }
 0x623   :  { %2142 = vmatprep.subr.bf16.mxu1 %v2141_v22 }
 0x626   :  { %2144 = vmatpush3.bf16.msra.mxu1 %v2141_v22 }
 0x6ad   :  { %v1605_v4 = vpop.xlane.xlu1 %1604 }
 0x6ae   :  { %v1608_v6 = vmul.f32 0.03125, %v1605_v4  ;;  %v1602_v8 = vpop.xlane.xlu0 %1601 }
 0x6af   :  { %v1607_v9 = vmul.f32 0.03125, %v1602_v8 }
 0x6b0   :  { %v1610_v11 = vsub.f32 %v1599_v0, %v1608_v6 }
 0x6b1   :  { %v1609_v12 = vsub.f32 %v1598_v1, %v1607_v9 }
 0x6b2   :  { %v1612_v15 = vmul.f32 %v1610_v11, %v1610_v11 }
 0x6b3   :  { %v1611_v13 = vmul.f32 %v1609_v12, %v1609_v12 }
 0x6b4   :  { %v1616_v7 = vsel %vm49_vm0, %v1612_v15, 0.0 }
 0x6b5   :  { %v1613_v14 = vsel %vm49_vm0, %v1611_v13, 0.0 }
 0x6b6   :  { %1614 = vadd.xlane.f32.xlu0 %v1613_v14 }
 0x6ba   :  { %1617 = vadd.xlane.f32.xlu0 %v1616_v7 }
 0x743   :  { %v1615_v32 = vpop.xlane.xlu0 %1614 }
 0x744   :  { %v1619_v34 = vmul.f32 0.03125, %v1615_v32 }
 0x746   :  { %v1621_v35 = vadd.f32 1e-05, %v1619_v34 }
 0x747   :  { %v1618_v10 = vpop.xlane.xlu0 %1617 }
 0x748   :  { %2206 = vrsqrt.f32 %v1621_v35  ;;  %v1620_v33 = vmul.f32 0.03125, %v1618_v10 }
 0x74a   :  { %v1622_v36 = vadd.f32 1e-05, %v1620_v33 }
 0x74c   :  { %2208 = vrsqrt.f32 %v1622_v36 }
 0x752   :  { %v2207_v37 = vpop.eup %2206 }
 0x753   :  { %v1625_v39 = vmul.f32 %v2207_v37, %v1609_v12 }
 0x755   :  { %v1632_v41 = vmul.f32 %v1919_v38, %v1625_v39 }
 0x756   :  { %v2209_v42 = vpop.eup %2208 }
 0x757   :  { %v1626_v43 = vmul.f32 %v2209_v42, %v1610_v11  ;;  %v1639_v44 = vadd.f32 %v1920_v40, %v1632_v41 }
 0x759   :  { %v1633_v45 = vmul.f32 %v1919_v38, %v1626_v43  ;;  %2099 = vmatprep.mubr.msk.f32.mxu1 %vm49_vm0, %v1639_v44 }
 0x75b   :  { %v1640_v46 = vadd.f32 %v1920_v40, %v1633_v45 }
 0x75d   :  { %2100 = vmatmul.mubr.msk.f32.vlgmr.msra.gmra.mrb[20].mxu1 %vm49_vm0, %v1640_v46 }
 0x830   :  { %v2101_v49 = vpop.f32.mrb[20].mxu1 }
 0x831   :  { %v1728_v50 = vadd.f32 %v2101_v49, %v1921_v18  ;;  %v1722_v51 = vpop.f32.mrb[21].mxu1 }
 0x832   :  { %v1723_v52 = vadd.f32 %v1921_v18, %v1722_v51 }
 0x833   :  { %v1732_v54 = vmax.f32 %v1728_v50, 0.0 }
 0x834   :  { %v1731_v53 = vmax.f32 %v1723_v52, 0.0 }
 0x836   :  { %2118 = vmatprep.mubr.msk.f32.mxu0 %vm1746_vm5, %v1731_v53 }
 0x837   :  { %2119 = vmatmul.mubr.msk.f32.vlgmr.msra.gmra.mrb[16].mxu0 %vm1746_vm5, %v1732_v54 }
 0x90a   :  { %v2120_v56 = vpop.f32.mrb[16].mxu0 }
 0x90b   :  { %v1825_v57 = vadd.f32 %v2120_v56, %v1924_v55  ;;  %v1819_v58 = vpop.f32.mrb[17].mxu0 }
 0x90c   :  { %v1820_v59 = vadd.f32 %v1924_v55, %v1819_v58 }
 0x90d   :  { %v1829_v60 = vadd.f32 %v1825_v57, %v1640_v46 }
 0x90e   :  { %v1828_v61 = vadd.f32 %v1820_v59, %v1639_v44 }
 0x90f   :  { %v1833_v62 = vsel %vm49_vm0, %v1829_v60, 0.0 }
 0x910   :  { %1834 = vadd.xlane.f32.xlu0 %v1833_v62  ;;  %v1830_v63 = vsel %vm49_vm0, %v1828_v61, 0.0 }
 0x911   :  { %1831 = vadd.xlane.f32.xlu1 %v1830_v63 }
 0x99d   :  { %v1835_v0 = vpop.xlane.xlu0 %1834 }
 0x99e   :  { %v1837_v1 = vmul.f32 0.03125, %v1835_v0  ;;  %v1832_v2 = vpop.xlane.xlu1 %1831 }
 0x99f   :  { %v1836_v3 = vmul.f32 0.03125, %v1832_v2 }
 0x9a0   :  { %v1839_v4 = vsub.f32 %v1829_v60, %v1837_v1 }
 0x9a1   :  { %v1838_v6 = vsub.f32 %v1828_v61, %v1836_v3 }
 0x9a2   :  { %v1841_v8 = vmul.f32 %v1839_v4, %v1839_v4 }
 0x9a3   :  { %v1840_v9 = vmul.f32 %v1838_v6, %v1838_v6 }
 0x9a4   :  { %v1845_v11 = vsel %vm49_vm0, %v1841_v8, 0.0 }
 0x9a5   :  { %1846 = vadd.xlane.f32.xlu0 %v1845_v11  ;;  %v1842_v12 = vsel %vm49_vm0, %v1840_v9, 0.0 }
 0x9a6   :  { %1843 = vadd.xlane.f32.xlu1 %v1842_v12 }
 0xa32   :  { %v1847_v13 = vpop.xlane.xlu0 %1846 }
 0xa33   :  { %v1849_v14 = vmul.f32 0.03125, %v1847_v13  ;;  %v1844_v15 = vpop.xlane.xlu1 %1843 }
 0xa34   :  { %v1848_v7 = vmul.f32 0.03125, %v1844_v15 }
 0xa35   :  { %v1851_v5 = vadd.f32 1e-05, %v1849_v14 }
 0xa36   :  { %v1850_v16 = vadd.f32 1e-05, %v1848_v7 }
 0xa37   :  { %2210 = vrsqrt.f32 %v1851_v5 }
 0xa38   :  { %2212 = vrsqrt.f32 %v1850_v16 }
 0xa41   :  { %v2211_v17 = vpop.eup %2210 }
 0xa42   :  { %v2213_v21 = vpop.eup %2212  ;;  %v1855_v22 = vmul.f32 %v2211_v17, %v1839_v4 }
 0xa43   :  { %v1854_v23 = vmul.f32 %v2213_v21, %v1838_v6 }
 0xa44   :  { %v1862_v25 = vmul.f32 %v1927_v20, %v1855_v22 }
 0xa45   :  { %v1861_v26 = vmul.f32 %v1927_v20, %v1854_v23 }
 0xa46   :  { %v1869_v27 = vadd.f32 %v1928_v24, %v1862_v25 }
 0xa47   :  { %v1868_v28 = vadd.f32 %v1928_v24, %v1861_v26 }
 0xa48   :  { %1871 = vst.msk [vmem:[#allocation5 + $0x8] sm:$0xff] %vm49_vm0, %v1869_v27 }
 0xa49   :  { %1870 = vst.msk [vmem:[#allocation5] sm:$0xff] %vm49_vm0, %v1868_v28 }
 0xa4a   :  { %2247 = shalt.err (!%p2244_p12)
}
 0xa4b   :  { %s2248_s24 = scalar_lea.hbm %s2635_s6, 256 }
 0xa4c   :  { %p2249_p13 = scmp.ne.s32.totalorder %s2635_s6, %s2248_s24  ;;  %p2252_p0 = scmp.lt.u32.totalorder %s2248_s24, %s2635_s6 }
 0xa4e   :  { %p2254_p1 = pnand %p2252_p0, %p2249_p13 }
 0xa50   :  { %2257 = shalt.err (!%p2254_p1)
}
 0xa51   :  { %1883 = dma.vmem_to_hbm [thread:$0]  %s1878_s21, 256, %s2635_s6, [#allocation4], %s2263_s7, %s2263_s7, %s2264_s8  }
 0xa52   :  { %2260 = dma.done.wait [#allocation4], 256  }
 0xa53   :  { %2261 = vsyncadd [#allocation4], 4294967040 }
 0xa54   :  { %1887 = vsyncpa [#allocation3], 1 }
 0xa55   :  { %1888 = vsyncpa [#allocation4], 1 }

</bundles_post_ra>
